<compile_context>
chip_gen: v7x
topology: tpu7x:2x2x1
jax: 0.10.0
libtpu: 0.0.40
codegen_flags: <defaults>
</compile_context>

<pallas_src>
import jax
import jax.numpy as jnp
from jax.experimental import pallas as pl
from jax.experimental.pallas import tpu as pltpu


def critic_kernel(x_ref, w1_ref, b1_ref, w2_ref, b2_ref, w3_ref, b3_ref, out_ref):
    # x_ref: (K, BT) f32, batch on lanes. Normalization already folded into w1/b1.
    # layer 1: (H1, K) @ (K, BT) -> (H1, BT)
    h1 = jnp.dot(w1_ref[...], x_ref[...],
                 preferred_element_type=jnp.float32) + b1_ref[...]
    h1 = jnp.maximum(h1, 0.0)

    # layer 2: (H2, H1) @ (H1, BT) -> (H2, BT)
    h2 = jnp.dot(w2_ref[...], h1,
                 preferred_element_type=jnp.float32) + b2_ref[...]
    h2 = jnp.maximum(h2, 0.0)

    # output layer (out_features = 1): VPU multiply + sublane reduce; the result
    # (1, BT) is a full-lane, unmasked store.
    out_ref[...] = (jnp.sum(h2 * w3_ref[...], axis=0, keepdims=True)
                    + b3_ref[...])


def critic_forward(state, action, params, *, block_batch=1024):
    """Run the Critic forward pass with a Pallas TPU kernel. Returns (B, 1) f32."""
    state_avg, state_std, w1, b1, w2, b2, w3, b3 = params
    B, S = state.shape
    A = action.shape[1]
    K = S + A
    H1 = w1.shape[1]
    H2 = w2.shape[1]

    # ---- fold state normalization into layer 1 (exact algebraic refactor) ----
    #   ((s - avg)/std) @ W1_s = s @ (W1_s * (1/std)[:,None]) - (avg/std) @ W1_s
    inv_std = 1.0 / state_std
    w1_folded = jnp.concatenate([w1[:S] * inv_std[:, None], w1[S:]], axis=0)
    b1_folded = b1 - (state_avg * inv_std) @ w1[:S]

    # ---- concat once, pad batch to a lane-aligned tile, go batch-on-lanes ----
    BT = max(128, min(block_batch, pl.cdiv(B, 128) * 128))
    B_pad = pl.cdiv(B, BT) * BT
    x = jnp.concatenate([state, action], axis=1).astype(jnp.float32)   # (B, K)
    if B_pad != B:
        x = jnp.pad(x, ((0, B_pad - B), (0, 0)))
    x_t = x.T                                                 # (K, B_pad) f32

    w1_t = w1_folded.T.astype(jnp.float32)                    # (H1, K)
    w2_t = w2.T.astype(jnp.float32)                           # (H2, H1)
    b1_c = b1_folded.reshape(-1, 1).astype(jnp.float32)       # (H1, 1)
    b2_c = b2.reshape(-1, 1).astype(jnp.float32)              # (H2, 1)
    w3_c = w3.reshape(-1, 1).astype(jnp.float32)              # (H2, 1)
    b3_c = b3.reshape(1, 1).astype(jnp.float32)               # (1, 1)

    const = lambda i: (0, 0)
    flops = 2 * B_pad * (K * H1 + H1 * H2 + H2)
    bytes_accessed = (K * B_pad * 4 + B_pad * 4
                      + (H1 * K + H2 * H1) * 4
                      + (H1 + H2 + H2 + 1) * 4)

    out_t = pl.pallas_call(
        critic_kernel,
        out_shape=jax.ShapeDtypeStruct((1, B_pad), jnp.float32),
        grid=(B_pad // BT,),
        in_specs=[
            pl.BlockSpec((K, BT), lambda i: (0, i)),      # input tile (pipelined)
            pl.BlockSpec((H1, K), const),                 # weights: VMEM-resident
            pl.BlockSpec((H1, 1), const),
            pl.BlockSpec((H2, H1), const),
            pl.BlockSpec((H2, 1), const),
            pl.BlockSpec((H2, 1), const),
            pl.BlockSpec((1, 1), const),
        ],
        out_specs=pl.BlockSpec((1, BT), lambda i: (0, i)),  # lane-dense output
        compiler_params=pltpu.CompilerParams(
            dimension_semantics=("parallel",)),             # megacore split (v7x)
        cost_estimate=pl.CostEstimate(
            flops=flops, transcendentals=0, bytes_accessed=bytes_accessed),
    )(x_t, w1_t, b1_c, w2_t, b2_c, w3_c, b3_c)

    return out_t[:, :B].T                                    # (B, 1)


def init_params(key, state_dim, action_dim, net_dims):
    """Deterministic init mimicking nn.Linear default (uniform +/- 1/sqrt(fan_in)),
    plus non-trivial state_avg/state_std so the folded normalization is exercised."""
    dims = [state_dim + action_dim, *net_dims, 1]
    key, k_avg, k_std = jax.random.split(key, 3)
    params = [0.1 * jax.random.normal(k_avg, (state_dim,), jnp.float32),        # state_avg
              jax.random.uniform(k_std, (state_dim,), jnp.float32, 0.5, 1.5)]   # state_std
    for i in range(len(dims) - 1):
        fan_in, fan_out = dims[i], dims[i + 1]
        key, kw, kb = jax.random.split(key, 3)
        bound = 1.0 / jnp.sqrt(fan_in)
        w = jax.random.uniform(kw, (fan_in, fan_out), jnp.float32, -bound, bound)
        b = jax.random.uniform(kb, (fan_out,), jnp.float32, -bound, bound)
        params.extend([w, b])
    return tuple(params)


def critic_reference(state, action, params):
    (state_avg, state_std, w1, b1, w2, b2, w3, b3) = params
    s = (state - state_avg) / state_std
    x = jnp.concatenate([s, action], axis=1)
    h1 = jnp.maximum(x @ w1 + b1, 0.0)
    h2 = jnp.maximum(h1 @ w2 + b2, 0.0)
    return h2 @ w3 + b3


if __name__ == "__main__":
    B, STATE_DIM, ACTION_DIM = 8, 16, 8
    NET_DIMS = [32, 32]

    key = jax.random.PRNGKey(0)
    k_s, k_a, k_p = jax.random.split(key, 3)
    state = jax.random.normal(k_s, (B, STATE_DIM), jnp.float32)
    action = jax.random.normal(k_a, (B, ACTION_DIM), jnp.float32)
    params = init_params(k_p, STATE_DIM, ACTION_DIM, NET_DIMS)

    value = jax.jit(critic_forward)(state, action, params)
    jax.block_until_ready(value)

    ref = critic_reference(state, action, params)
    assert value.shape == (B, 1)
    # f32 matmuls throughout -> tight tolerance vs the f32 reference.
    assert jnp.allclose(value, ref, atol=1e-4, rtol=1e-4), float(
        jnp.max(jnp.abs(value - ref)))

    print("KERNEL_OK")
</pallas_src>

<mosaic_0001>
module attributes {stable_mosaic.version = 11 : i64} {
  func.func @critic_kernel(%arg0: i32, %arg1: memref<24x128xf32, #tpu.memory_space<vmem>>, %arg2: memref<32x24xf32, #tpu.memory_space<vmem>>, %arg3: memref<32x1xf32, #tpu.memory_space<vmem>>, %arg4: memref<32x32xf32, #tpu.memory_space<vmem>>, %arg5: memref<32x1xf32, #tpu.memory_space<vmem>>, %arg6: memref<32x1xf32, #tpu.memory_space<vmem>>, %arg7: memref<1x1xf32, #tpu.memory_space<vmem>>, %arg8: memref<1x128xf32, #tpu.memory_space<vmem>>) attributes {dimension_semantics = [#tpu.dimension_semantics<parallel>], iteration_bounds = array<i64: 1>, scalar_prefetch = 0 : i64, scratch_operands = 0 : i64, tpu.core_type = #tpu.core_type<tc>, window_params = [{transform_indices = @transform_0, window_bounds = array<i64: 24, 128>}, {pipeline_mode = #tpu.pipeline_mode<synchronous>, transform_indices = @transform_1, window_bounds = array<i64: 32, 24>}, {pipeline_mode = #tpu.pipeline_mode<synchronous>, transform_indices = @transform_2, window_bounds = array<i64: 32, 1>}, {pipeline_mode = #tpu.pipeline_mode<synchronous>, transform_indices = @transform_3, window_bounds = array<i64: 32, 32>}, {pipeline_mode = #tpu.pipeline_mode<synchronous>, transform_indices = @transform_4, window_bounds = array<i64: 32, 1>}, {pipeline_mode = #tpu.pipeline_mode<synchronous>, transform_indices = @transform_5, window_bounds = array<i64: 32, 1>}, {pipeline_mode = #tpu.pipeline_mode<synchronous>, transform_indices = @transform_6, window_bounds = array<i64: 1, 1>}, {transform_indices = @transform_7, window_bounds = array<i64: 1, 128>}]} {
    %c0 = arith.constant 0 : index
    %c0_0 = arith.constant 0 : index
    %0 = vector.load %arg2[%c0, %c0_0] : memref<32x24xf32, #tpu.memory_space<vmem>>, vector<32x24xf32>
    %c0_1 = arith.constant 0 : index
    %c0_2 = arith.constant 0 : index
    %1 = vector.load %arg1[%c0_1, %c0_2] : memref<24x128xf32, #tpu.memory_space<vmem>>, vector<24x128xf32>
    %cst = arith.constant dense<0.000000e+00> : vector<32x128xf32>
    %2 = tpu.matmul %0, %1, %cst {dimension_numbers = #tpu.dot_dimension_numbers<[1], [0], [0], [1], [0, 0, 1, 1], [], []>} : vector<32x24xf32>, vector<24x128xf32>, vector<32x128xf32> -> vector<32x128xf32>
    %c0_3 = arith.constant 0 : index
    %c0_4 = arith.constant 0 : index
    %3 = vector.load %arg3[%c0_3, %c0_4] : memref<32x1xf32, #tpu.memory_space<vmem>>, vector<32x1xf32>
    %4 = vector.broadcast %3 : vector<32x1xf32> to vector<32x128xf32>
    %5 = arith.addf %2, %4 : vector<32x128xf32>
    %cst_5 = arith.constant 0.000000e+00 : f32
    %6 = vector.broadcast %cst_5 : f32 to vector<32x128xf32>
    %7 = arith.maximumf %5, %6 : vector<32x128xf32>
    %c0_6 = arith.constant 0 : index
    %c0_7 = arith.constant 0 : index
    %8 = vector.load %arg4[%c0_6, %c0_7] : memref<32x32xf32, #tpu.memory_space<vmem>>, vector<32x32xf32>
    %cst_8 = arith.constant dense<0.000000e+00> : vector<32x128xf32>
    %9 = tpu.matmul %8, %7, %cst_8 {dimension_numbers = #tpu.dot_dimension_numbers<[1], [0], [0], [1], [0, 0, 1, 1], [], []>} : vector<32x32xf32>, vector<32x128xf32>, vector<32x128xf32> -> vector<32x128xf32>
    %c0_9 = arith.constant 0 : index
    %c0_10 = arith.constant 0 : index
    %10 = vector.load %arg5[%c0_9, %c0_10] : memref<32x1xf32, #tpu.memory_space<vmem>>, vector<32x1xf32>
    %11 = vector.broadcast %10 : vector<32x1xf32> to vector<32x128xf32>
    %12 = arith.addf %9, %11 : vector<32x128xf32>
    %cst_11 = arith.constant 0.000000e+00 : f32
    %13 = vector.broadcast %cst_11 : f32 to vector<32x128xf32>
    %14 = arith.maximumf %12, %13 : vector<32x128xf32>
    %c0_12 = arith.constant 0 : index
    %c0_13 = arith.constant 0 : index
    %15 = vector.load %arg6[%c0_12, %c0_13] : memref<32x1xf32, #tpu.memory_space<vmem>>, vector<32x1xf32>
    %16 = vector.broadcast %15 : vector<32x1xf32> to vector<32x128xf32>
    %17 = arith.mulf %14, %16 : vector<32x128xf32>
    %cst_14 = arith.constant dense<0.000000e+00> : vector<128xf32>
    %18 = vector.multi_reduction <add>, %17, %cst_14 [0] : vector<32x128xf32> to vector<128xf32>
    %19 = vector.shape_cast %18 : vector<128xf32> to vector<1x128xf32>
    %c0_15 = arith.constant 0 : index
    %c0_16 = arith.constant 0 : index
    %20 = vector.load %arg7[%c0_15, %c0_16] : memref<1x1xf32, #tpu.memory_space<vmem>>, vector<1x1xf32>
    %21 = vector.broadcast %20 : vector<1x1xf32> to vector<1x128xf32>
    %22 = arith.addf %19, %21 : vector<1x128xf32>
    %c0_17 = arith.constant 0 : index
    %c0_18 = arith.constant 0 : index
    %23 = vector.load %arg8[%c0_17, %c0_18] : memref<1x128xf32, #tpu.memory_space<vmem>>, vector<1x128xf32>
    tpu.vector_store %arg8[%c0_17, %c0_18], %22 {strides = array<i32>} : memref<1x128xf32, #tpu.memory_space<vmem>>, vector<1x128xf32>,
    return
  }
  func.func @transform_0(%arg0: i32) -> (i32, i32) {
    %c0_i32 = arith.constant 0 : i32
    %c0_i32_0 = arith.constant 0 : i32
    return %c0_i32, %arg0 : i32, i32
  }
  func.func @transform_1(%arg0: i32) -> (i32, i32) {
    %c0_i32 = arith.constant 0 : i32
    %c0_i32_0 = arith.constant 0 : i32
    %c0_i32_1 = arith.constant 0 : i32
    return %c0_i32, %c0_i32_0 : i32, i32
  }
  func.func @transform_2(%arg0: i32) -> (i32, i32) {
    %c0_i32 = arith.constant 0 : i32
    %c0_i32_0 = arith.constant 0 : i32
    %c0_i32_1 = arith.constant 0 : i32
    return %c0_i32, %c0_i32_0 : i32, i32
  }
  func.func @transform_3(%arg0: i32) -> (i32, i32) {
    %c0_i32 = arith.constant 0 : i32
    %c0_i32_0 = arith.constant 0 : i32
    %c0_i32_1 = arith.constant 0 : i32
    return %c0_i32, %c0_i32_0 : i32, i32
  }
  func.func @transform_4(%arg0: i32) -> (i32, i32) {
    %c0_i32 = arith.constant 0 : i32
    %c0_i32_0 = arith.constant 0 : i32
    %c0_i32_1 = arith.constant 0 : i32
    return %c0_i32, %c0_i32_0 : i32, i32
  }
  func.func @transform_5(%arg0: i32) -> (i32, i32) {
    %c0_i32 = arith.constant 0 : i32
    %c0_i32_0 = arith.constant 0 : i32
    %c0_i32_1 = arith.constant 0 : i32
    return %c0_i32, %c0_i32_0 : i32, i32
  }
  func.func @transform_6(%arg0: i32) -> (i32, i32) {
    %c0_i32 = arith.constant 0 : i32
    %c0_i32_0 = arith.constant 0 : i32
    %c0_i32_1 = arith.constant 0 : i32
    return %c0_i32, %c0_i32_0 : i32, i32
  }
  func.func @transform_7(%arg0: i32) -> (i32, i32) {
    %c0_i32 = arith.constant 0 : i32
    %c0_i32_0 = arith.constant 0 : i32
    return %c0_i32, %arg0 : i32, i32
  }
}

</mosaic_0001>

<bundles_post_ra>
// kernel: critic_forward.1
= control target key start
LH: loop header
LB: loop body
LE: loop exit
PB: predicated region body
PF: predicated region fallthrough
CT: control target
= control target key end

     0   :  { %vm59_vm0 = vcmask 195584   ;;  %v408_v2 = vmov 0   ;;  %vm189_vm1 = vcmask 261120   ;;  %s532_s0 = inlined_call_operand.vmem [shape: f32[24,128], index: 0, kind: input, shape index: {}]   ;;  %s533_s1 = inlined_call_operand.vmem [shape: f32[32,24], index: 1, kind: input, shape index: {}]   ;;  %s534_s2 = inlined_call_operand.vmem [shape: f32[32,1], index: 2, kind: input, shape index: {}]   ;;  %s535_s6 = inlined_call_operand.<no memory space> [shape: f32[1,1], index: 6, kind: input, shape index: {}]   ;;  %s536_s4 = inlined_call_operand.vmem [shape: f32[32,1], index: 4, kind: input, shape index: {}]   ;;  %s537_s5 = inlined_call_operand.vmem [shape: f32[32,1], index: 5, kind: input, shape index: {}]   ;;  %s538_s3 = inlined_call_operand.vmem [shape: f32[32,32], index: 3, kind: input, shape index: {}]   ;;  %s539_s7 = inlined_call_operand.vmem [shape: f32[1,128], index: 7, kind: output, shape index: {}]  }
   0x1   :  { %v32_v0 = vld [vmem:[%s532_s0] sm:$0xff]  ;;  %v33_v1 = vld [vmem:[%s532_s0 + $0x8] sm:$0xff]  ;;  %406 = vset.pattern.permute.xlu0 %v408_v2  ;;  %407 = vset.pattern.permute.xlu1 %v408_v2  ;;  %v12_v3 = vstv %s535_s6  ;;  %v34_v6 = vld [vmem:[%s532_s0 + $0x10] sm:$0xff] }
   0x2   :  { %v393_v4 = vpack.c.bf16 %v33_v1, %v32_v0  ;;  %v28_v5 = vld [vmem:[%s533_s1] sm:$0xff]  ;;  %13 = vst [vmem:[#allocation2] sm:$0x1] %v12_v3  ;;  %v37_v8 = vld [vmem:[%s534_s2 + $0x10] sm:$0xff]  ;;  %v36_v9 = vld [vmem:[%s534_s2 + $0x8] sm:$0xff] }
   0x3   :  { %373 = vmatprep.mubr.msk.f32.mxu0 %vm59_vm0, %v28_v5  ;;  %v35_v7 = vld [vmem:[%s534_s2] sm:$0xff]  ;;  %51 = vperm.xlu1 %407, %v37_v8   ;;  %v38_v10 = vld [vmem:[%s534_s2 + $0x18] sm:$0xff]  ;;  %v29_v11 = vld [vmem:[%s533_s1 + $0x8] sm:$0xff] }
   0x4   :  { %394 = vmatprep.subr.bf16.mxu0 %v393_v4  ;;  %41 = vperm.xlu0 %406, %v35_v7   ;;  %v30_v12 = vld [vmem:[%s533_s1 + $0x10] sm:$0xff]  ;;  %v165_v13 = vld [vmem:[%s536_s4] sm:$0xff]  ;;  %v166_v14 = vld [vmem:[%s536_s4 + $0x8] sm:$0xff]  ;;  %v334_v7 = vlaneseq }
   0x5   :  { %396 = vmatpush3.bf16.msra.mxu0 %v393_v4  ;;  %v31_v15 = vld [vmem:[%s533_s1 + $0x18] sm:$0xff]  ;;  %v167_v16 = vld [vmem:[%s536_s4 + $0x10] sm:$0xff]  ;;  %v291_v18 = vld [vmem:[%s537_s5] sm:$0xff] }
   0x6   :  { %371 = vmatprep.subr.mxu0 %v34_v6  ;;  %v168_v17 = vld [vmem:[%s536_s4 + $0x18] sm:$0xff]  ;;  %v292_v19 = vld [vmem:[%s537_s5 + $0x8] sm:$0xff]  ;;  %v293_v20 = vld [vmem:[%s537_s5 + $0x10] sm:$0xff] }
   0x7   :  { %56 = vperm.xlu1 %407, %v38_v10   ;;  %v294_v21 = vld [vmem:[%s537_s5 + $0x18] sm:$0xff]  ;;  %v161_v23 = vld [vmem:[%s538_s3] sm:$0xff]  ;;  %v162_v42 = vld [vmem:[%s538_s3 + $0x8] sm:$0xff]  ;;  %v335_v10 = vshrl.u32 %v334_v7, 7 }
   0x8   :  { %46 = vperm.xlu0 %406, %v36_v9   ;;  %387 = vmatprep.mubr.msk.f32.mxu1 %vm189_vm1, %v161_v23  ;;  %v163_v43 = vld [vmem:[%s538_s3 + $0x10] sm:$0xff]  ;;  %v164_v44 = vld [vmem:[%s538_s3 + $0x18] sm:$0xff] }
   0x9   :  { %372 = vmatpush3.msra.mxu0 %v34_v6  ;;  %v328_v22 = vld [vmem:[#allocation2] sm:$0x1] }
   0xa   :  { %374 = vmatmul.mubr.msk.f32.vlgmr.msra.gmra.mrb[0].mxu0 %vm59_vm0, %v29_v11 }
   0xb   :  { %376 = vmatprep.mubr.msk.f32.mxu0 %vm59_vm0, %v30_v12  ;;  %176 = vperm.xlu1 %407, %v166_v14  }
   0xc   :  { %171 = vperm.xlu0 %406, %v165_v13   ;;  %v336_v13 = vsub.s32 0, %v335_v10 }
   0xe   :  { %377 = vmatmul.mubr.msk.f32.gmra.mrb[2].mxu0 %vm59_vm0, %v31_v15 }
   0xf   :  { %186 = vperm.xlu1 %407, %v168_v17  }
  0x10   :  { %181 = vperm.xlu0 %406, %v167_v16  }
  0x13   :  { %302 = vperm.xlu1 %407, %v292_v19  }
  0x14   :  { %297 = vperm.xlu0 %406, %v291_v18  }
  0x17   :  { %312 = vperm.xlu1 %407, %v294_v21  }
  0x18   :  { %307 = vperm.xlu0 %406, %v293_v20  }
  0x1c   :  { %331 = vperm.xlu0 %406, %v328_v22  }
  0x82   :  { %v52_v25 = vpop.permute.xlu1 %51 }
  0x83   :  { %v42_v24 = vpop.permute.xlu0 %41 }
  0x86   :  { %v57_v32 = vpop.permute.xlu1 %56 }
  0x87   :  { %v47_v26 = vpop.permute.xlu0 %46 }
  0x8a   :  { %v177_v46 = vpop.permute.xlu1 %176 }
  0x8b   :  { %v172_v45 = vpop.permute.xlu0 %171 }
  0x8e   :  { %v187_v48 = vpop.permute.xlu1 %186 }
  0x8f   :  { %v182_v47 = vpop.permute.xlu0 %181 }
  0x92   :  { %v303_v55 = vpop.permute.xlu1 %302 }
  0x93   :  { %v298_v53 = vpop.permute.xlu0 %297 }
  0x96   :  { %v313_v4 = vpop.permute.xlu1 %312 }
  0x97   :  { %v308_v2 = vpop.permute.xlu0 %307 }
  0x9b   :  { %v332_v15 = vpop.permute.xlu0 %331 }
  0x9c   :  { %v337_v17 = vrot.slane %v332_v15, %v336_v13 }
  0xdd   :  { %v375_v27 = vpop.f32.mrb[0].mxu0 }
  0xde   :  { %v144_v28 = vadd.f32 %v375_v27, %v47_v26  ;;  %v138_v29 = vpop.f32.mrb[1].mxu0 }
  0xdf   :  { %v139_v30 = vadd.f32 %v138_v29, %v42_v24 }
  0xe0   :  { %v158_v31 = vmax.f32 %v144_v28, 0.0 }
  0xe1   :  { %v157_v33 = vmax.f32 %v139_v30, 0.0  ;;  %v378_v34 = vpop.f32.mrb[2].mxu0 }
  0xe2   :  { %v154_v35 = vadd.f32 %v378_v34, %v57_v32  ;;  %v148_v36 = vpop.f32.mrb[3].mxu0 }
  0xe3   :  { %v149_v37 = vadd.f32 %v148_v36, %v52_v25  ;;  %v397_v38 = vpack.c.bf16 %v158_v31, %v157_v33 }
  0xe4   :  { %v160_v39 = vmax.f32 %v154_v35, 0.0 }
  0xe5   :  { %v159_v40 = vmax.f32 %v149_v37, 0.0  ;;  %398 = vmatprep.subr.bf16.mxu1 %v397_v38 }
  0xe6   :  { %400 = vmatpush3.bf16.msra.mxu1 %v397_v38 }
  0xe7   :  { %v401_v41 = vpack.c.bf16 %v160_v39, %v159_v40 }
  0xe9   :  { %402 = vmatprep.subr.bf16.mxu1 %v401_v41 }
  0xea   :  { %404 = vmatpush3.bf16.msra.mxu1 %v401_v41 }
  0xed   :  { %388 = vmatmul.mubr.msk.f32.vlgmr.msra.gmra.mrb[0].mxu1 %vm189_vm1, %v162_v42 }
  0xee   :  { %390 = vmatprep.mubr.msk.f32.mxu1 %vm189_vm1, %v163_v43 }
  0xf1   :  { %391 = vmatmul.mubr.msk.f32.gmra.mrb[2].mxu1 %vm189_vm1, %v164_v44 }
 0x1c0   :  { %v389_v49 = vpop.f32.mrb[0].mxu1 }
 0x1c1   :  { %v274_v50 = vadd.f32 %v389_v49, %v177_v46  ;;  %v268_v51 = vpop.f32.mrb[1].mxu1 }
 0x1c2   :  { %v269_v52 = vadd.f32 %v268_v51, %v172_v45 }
 0x1c3   :  { %v288_v54 = vmax.f32 %v274_v50, 0.0 }
 0x1c4   :  { %v287_v56 = vmax.f32 %v269_v52, 0.0  ;;  %v392_v57 = vpop.f32.mrb[2].mxu1 }
 0x1c5   :  { %v316_v58 = vmul.f32 %v303_v55, %v288_v54  ;;  %v284_v59 = vadd.f32 %v392_v57, %v187_v48  ;;  %v278_v60 = vpop.f32.mrb[3].mxu1 }
 0x1c6   :  { %v315_v61 = vmul.f32 %v298_v53, %v287_v56  ;;  %v279_v62 = vadd.f32 %v278_v60, %v182_v47 }
 0x1c7   :  { %v290_v0 = vmax.f32 %v284_v59, 0.0 }
 0x1c8   :  { %v319_v63 = vadd.f32 %v316_v58, %v315_v61  ;;  %v289_v1 = vmax.f32 %v279_v62, 0.0 }
 0x1c9   :  { %v318_v5 = vmul.f32 %v313_v4, %v290_v0 }
 0x1ca   :  { %v317_v3 = vmul.f32 %v308_v2, %v289_v1 }
 0x1cc   :  { %v320_v6 = vadd.f32 %v319_v63, %v317_v3 }
 0x1ce   :  { %v321_v8 = vadd.f32 %v320_v6, %v318_v5 }
 0x1d0   :  { %v322_v9 = vrot.slane %v321_v8, 4 }
 0x1d2   :  { %v323_v11 = vadd.f32 %v322_v9, %v321_v8 }
 0x1d4   :  { %v324_v12 = vrot.slane %v323_v11, 2 }
 0x1d6   :  { %v325_v14 = vadd.f32 %v324_v12, %v323_v11 }
 0x1d8   :  { %v326_v16 = vrot.slane %v325_v14, 1 }
 0x1da   :  { %v327_v18 = vadd.f32 %v326_v16, %v325_v14 }
 0x1dc   :  { %v338_v19 = vadd.f32 %v337_v17, %v327_v18 }
 0x1de   :  { %339 = vst [vmem:[%s539_s7] sm:$0x1] %v338_v19 }

</bundles_post_ra>
